<compile_context>
chip_gen: v7x
topology: tpu7x:2x2x1
jax: 0.10.0
libtpu: 0.0.40
codegen_flags: <defaults>
</compile_context>

<pallas_src>
import jax
import jax.numpy as jnp
from jax.experimental import pallas as pl
from jax.experimental.pallas import tpu as pltpu
from jax.scipy.linalg import block_diag


def _make_kernel(fold, chunk):
    def _nerf_head_kernel(x_ref, w1_ref, b1_ref, w2f_ref, b2_ref, o_ref):
        # Layer 1: cast x to bf16 *in-kernel* (VPU op with plenty of slack;
        # keeps the HBM x stream at its original width).
        xb = x_ref[...].astype(w1_ref.dtype)
        h = jnp.dot(xb, w1_ref[...], preferred_element_type=jnp.float32)
        h = jnp.maximum(h + b1_ref[...], 0.0)

        # Layer 2 fused with the sublane->lane fold: row-chunk j of h is
        # multiplied by a copy of W2 positioned in lane group j, and the
        # partial results are summed.  Only dots / static slices / adds, so
        # this lowers cleanly; output block is lane-dense (>=128 lanes).
        acc = jnp.zeros(o_ref.shape, jnp.float32)
        for j in range(fold):
            hj = h[j * chunk:(j + 1) * chunk, :].astype(w2f_ref.dtype)
            acc = acc + jnp.dot(hj, w2f_ref[j],
                                preferred_element_type=jnp.float32)
        o_ref[...] = (acc + b2_ref[...]).astype(o_ref.dtype)
    return _nerf_head_kernel


def _round_up(a, b):
    return pl.cdiv(a, b) * b


def nerf_head(x, w1, b1, w2, b2, *, block_rows=8192):
    """NeRFHead forward: relu(x @ w1.T + b1) @ w2.T + b2.

    x : (..., W)          (any leading batch dims, like nn.Linear)
    w1: (W, W)  b1: (W,)  w2: (out_dim, W)  b2: (out_dim,)   (torch layouts)
    """
    orig_dtype = x.dtype
    *lead, W = x.shape
    out_dim = w2.shape[0]
    N = 1
    for d in lead:
        N *= d
    x2 = x.reshape(N, W)

    # ---- lane packing: P points per packed row (input lane dim -> 128) ------
    P = 128 // W if (W <= 128 and 128 % W == 0) else 1
    Wp, Op = W * P, out_dim * P

    w1_t = w1.T                       # (W, W): kernel computes x @ w1_t
    w2_t = w2.T                       # (W, out_dim)
    if P > 1:
        w1_big = block_diag(*([w1_t] * P))        # (Wp, Wp)
        w2_big = block_diag(*([w2_t] * P))        # (Wp, Op)
        b1_big = jnp.tile(b1, P)
        b2_big = jnp.tile(b2, P)
    else:
        w1_big, w2_big, b1_big, b2_big = w1_t, w2_t, b1, b2

    # ---- output fold factor: make the stored block >=128 lanes wide ---------
    FOLD = 128 // Op if (Op <= 128 and 128 % Op == 0) else 1
    OpF = Op * FOLD
    if FOLD > 1:
        # FOLD positioned copies of W2: copy j writes lane group [j*Op, (j+1)*Op).
        w2_fold = jnp.zeros((FOLD, Wp, OpF), w2_big.dtype)
        for j in range(FOLD):
            w2_fold = w2_fold.at[j, :, j * Op:(j + 1) * Op].set(w2_big)
        b2_fold = jnp.tile(b2_big, FOLD)
    else:
        w2_fold = w2_big[None]
        b2_fold = b2_big

    # ---- pick rows/step by step count (amortize ~0.35us/step, cap padding) --
    ROW_ALIGN = 16 * FOLD                 # 16 for bf16 sublane pack, x fold
    rows = pl.cdiv(N, P)                  # packed rows needed
    steps = max(2, pl.cdiv(rows, block_rows))   # >=2 steps for v7x megacore
    steps = steps + (steps % 2)                 # prefer an even step count
    pr = _round_up(pl.cdiv(rows, steps), ROW_ALIGN)
    steps = pl.cdiv(rows, pr)                   # may shrink for tiny inputs
    rows_pad = steps * pr
    n_pad = rows_pad * P
    if n_pad != N:
        x2 = jnp.pad(x2, ((0, n_pad - N), (0, 0)))

    # NOTE: x stays in its original dtype here (cast happens inside the kernel).
    x_packed = x2.reshape(rows_pad, Wp)

    cdt = jnp.bfloat16
    w1_big = w1_big.astype(cdt)
    w2_fold = w2_fold.astype(cdt)
    b1_2d = b1_big.reshape(1, Wp).astype(jnp.float32)
    b2_2d = b2_fold.reshape(1, OpF).astype(jnp.float32)

    chunk = pr // FOLD
    grid = (steps,)

    flops = 2 * rows_pad * Wp * (Wp + OpF)
    bytes_accessed = (x_packed.size * x_packed.dtype.itemsize
                      + w1_big.size * w1_big.dtype.itemsize
                      + w2_fold.size * w2_fold.dtype.itemsize
                      + (Wp + OpF) * 4
                      + rows_pad * Op * jnp.dtype(orig_dtype).itemsize)

    out = pl.pallas_call(
        _make_kernel(FOLD, chunk),
        out_shape=jax.ShapeDtypeStruct((rows_pad // FOLD, OpF), orig_dtype),
        grid_spec=pltpu.PrefetchScalarGridSpec(
            num_scalar_prefetch=0,
            grid=grid,
            in_specs=[
                pl.BlockSpec((pr, Wp), lambda i: (i, 0)),         # packed x rows
                pl.BlockSpec((Wp, Wp), lambda i: (0, 0)),          # W1 (resident)
                pl.BlockSpec((1, Wp), lambda i: (0, 0)),           # b1 (resident)
                pl.BlockSpec((FOLD, Wp, OpF), lambda i: (0, 0, 0)),  # W2 fold (resident)
                pl.BlockSpec((1, OpF), lambda i: (0, 0)),          # b2 (resident)
            ],
            out_specs=pl.BlockSpec((chunk, OpF), lambda i: (i, 0)),  # lane-dense
        ),
        compiler_params=pltpu.CompilerParams(
            dimension_semantics=("parallel",),      # megacore shard (v7x)
            vmem_limit_bytes=48 * 1024 * 1024),     # actual budget ~15-20 MiB
        cost_estimate=pl.CostEstimate(
            flops=flops, transcendentals=0, bytes_accessed=bytes_accessed),
    )(x_packed, w1_big, b1_2d, w2_fold, b2_2d)

    # Undo the in-kernel chunk->lane fold; this transpose fuses with the
    # un-pad slice below (output stream is ~10-20% of total traffic).
    if FOLD > 1:
        y = (out.reshape(steps, chunk, FOLD, Op)
                .transpose(0, 2, 1, 3)
                .reshape(rows_pad, Op))
    else:
        y = out
    y = y.reshape(n_pad, out_dim)[:N]
    return y.reshape(*lead, out_dim)


def nerf_head_ref(x, w1, b1, w2, b2):
    """Pure-JAX reference mimicking the kernel's bf16-input / f32-acc numerics."""
    xb = x.astype(jnp.bfloat16).astype(jnp.float32)
    w1b = w1.T.astype(jnp.bfloat16).astype(jnp.float32)
    w2b = w2.T.astype(jnp.bfloat16).astype(jnp.float32)
    h = jnp.maximum(xb @ w1b + b1, 0.0)
    h = h.astype(jnp.bfloat16).astype(jnp.float32)
    return (h @ w2b + b2).astype(x.dtype)


if __name__ == "__main__":
    # Small shapes consistent with the module: hidden W = 32, out_dim = 4,
    # batch of 2 rays x 25 samples (N = 50, deliberately not a tile multiple
    # to exercise padding + fold un-permute paths).
    W, out_dim = 32, 4
    batch, n_samples = 2, 25

    key = jax.random.PRNGKey(0)
    kx, kw1, kb1, kw2, kb2 = jax.random.split(key, 5)

    x = jax.random.normal(kx, (batch, n_samples, W), dtype=jnp.float32)
    # nn.Linear shapes: weight [out, in], bias [out].
    w1 = jax.random.normal(kw1, (W, W), dtype=jnp.float32) * 0.1
    b1 = jax.random.normal(kb1, (W,), dtype=jnp.float32) * 0.1
    w2 = jax.random.normal(kw2, (out_dim, W), dtype=jnp.float32) * 0.1
    b2 = jax.random.normal(kb2, (out_dim,), dtype=jnp.float32) * 0.1

    out = nerf_head(x, w1, b1, w2, b2)
    out = jax.block_until_ready(out)

    ref = nerf_head_ref(x, w1, b1, w2, b2)
    assert out.shape == (batch, n_samples, out_dim)
    assert jnp.allclose(out, ref, atol=2e-2, rtol=2e-2), "mismatch vs reference"

    print("KERNEL_OK")
</pallas_src>

<mosaic_0001>
module attributes {stable_mosaic.version = 11 : i64} {
  func.func @_nerf_head_kernel(%arg0: i32, %arg1: memref<128x128xf32, #tpu.memory_space<vmem>>, %arg2: memref<128x128xbf16, #tpu.memory_space<vmem>>, %arg3: memref<1x128xf32, #tpu.memory_space<vmem>>, %arg4: memref<8x128x128xbf16, #tpu.memory_space<vmem>>, %arg5: memref<1x128xf32, #tpu.memory_space<vmem>>, %arg6: memref<16x128xf32, #tpu.memory_space<vmem>>) attributes {dimension_semantics = [#tpu.dimension_semantics<parallel>], iteration_bounds = array<i64: 1>, scalar_prefetch = 0 : i64, scratch_operands = 0 : i64, tpu.core_type = #tpu.core_type<tc>, window_params = [{transform_indices = @transform_0, window_bounds = array<i64: 128, 128>}, {pipeline_mode = #tpu.pipeline_mode<synchronous>, transform_indices = @transform_1, window_bounds = array<i64: 128, 128>}, {pipeline_mode = #tpu.pipeline_mode<synchronous>, transform_indices = @transform_2, window_bounds = array<i64: 1, 128>}, {pipeline_mode = #tpu.pipeline_mode<synchronous>, transform_indices = @transform_3, window_bounds = array<i64: 8, 128, 128>}, {pipeline_mode = #tpu.pipeline_mode<synchronous>, transform_indices = @transform_4, window_bounds = array<i64: 1, 128>}, {transform_indices = @transform_5, window_bounds = array<i64: 16, 128>}]} {
    %c0 = arith.constant 0 : index
    %c0_0 = arith.constant 0 : index
    %0 = vector.load %arg1[%c0, %c0_0] : memref<128x128xf32, #tpu.memory_space<vmem>>, vector<128x128xf32>
    %1 = arith.truncf %0 : vector<128x128xf32> to vector<128x128xbf16>
    %c0_1 = arith.constant 0 : index
    %c0_2 = arith.constant 0 : index
    %2 = vector.load %arg2[%c0_1, %c0_2] : memref<128x128xbf16, #tpu.memory_space<vmem>>, vector<128x128xbf16>
    %cst = arith.constant dense<0.000000e+00> : vector<128x128xf32>
    %3 = tpu.matmul %1, %2, %cst {dimension_numbers = #tpu.dot_dimension_numbers<[1], [0], [0], [1], [0, 0, 1, 1], [], []>} : vector<128x128xbf16>, vector<128x128xbf16>, vector<128x128xf32> -> vector<128x128xf32>
    %c0_3 = arith.constant 0 : index
    %c0_4 = arith.constant 0 : index
    %4 = vector.load %arg3[%c0_3, %c0_4] : memref<1x128xf32, #tpu.memory_space<vmem>>, vector<1x128xf32>
    %5 = vector.broadcast %4 : vector<1x128xf32> to vector<128x128xf32>
    %6 = arith.addf %3, %5 : vector<128x128xf32>
    %cst_5 = arith.constant 0.000000e+00 : f32
    %7 = vector.broadcast %cst_5 : f32 to vector<128x128xf32>
    %8 = arith.maximumf %6, %7 : vector<128x128xf32>
    %cst_6 = arith.constant 0.000000e+00 : f32
    %9 = vector.broadcast %cst_6 : f32 to vector<16x128xf32>
    %10 = vector.extract_strided_slice %8 {offsets = [0, 0], sizes = [16, 128], strides = [1, 1]} : vector<128x128xf32> to vector<16x128xf32>
    %11 = arith.truncf %10 : vector<16x128xf32> to vector<16x128xbf16>
    %c0_7 = arith.constant 0 : index
    %c0_8 = arith.constant 0 : index
    %c0_9 = arith.constant 0 : index
    %12 = vector.load %arg4[%c0_7, %c0_8, %c0_9] : memref<8x128x128xbf16, #tpu.memory_space<vmem>>, vector<1x128x128xbf16>
    %13 = vector.shape_cast %12 : vector<1x128x128xbf16> to vector<128x128xbf16>
    %cst_10 = arith.constant dense<0.000000e+00> : vector<16x128xf32>
    %14 = tpu.matmul %11, %13, %cst_10 {dimension_numbers = #tpu.dot_dimension_numbers<[1], [0], [0], [1], [0, 0, 1, 1], [], []>} : vector<16x128xbf16>, vector<128x128xbf16>, vector<16x128xf32> -> vector<16x128xf32>
    %15 = arith.addf %9, %14 : vector<16x128xf32>
    %16 = vector.extract_strided_slice %8 {offsets = [16, 0], sizes = [16, 128], strides = [1, 1]} : vector<128x128xf32> to vector<16x128xf32>
    %17 = arith.truncf %16 : vector<16x128xf32> to vector<16x128xbf16>
    %c1 = arith.constant 1 : index
    %c0_11 = arith.constant 0 : index
    %c0_12 = arith.constant 0 : index
    %18 = vector.load %arg4[%c1, %c0_11, %c0_12] : memref<8x128x128xbf16, #tpu.memory_space<vmem>>, vector<1x128x128xbf16>
    %19 = vector.shape_cast %18 : vector<1x128x128xbf16> to vector<128x128xbf16>
    %cst_13 = arith.constant dense<0.000000e+00> : vector<16x128xf32>
    %20 = tpu.matmul %17, %19, %cst_13 {dimension_numbers = #tpu.dot_dimension_numbers<[1], [0], [0], [1], [0, 0, 1, 1], [], []>} : vector<16x128xbf16>, vector<128x128xbf16>, vector<16x128xf32> -> vector<16x128xf32>
    %21 = arith.addf %15, %20 : vector<16x128xf32>
    %22 = vector.extract_strided_slice %8 {offsets = [32, 0], sizes = [16, 128], strides = [1, 1]} : vector<128x128xf32> to vector<16x128xf32>
    %23 = arith.truncf %22 : vector<16x128xf32> to vector<16x128xbf16>
    %c2 = arith.constant 2 : index
    %c0_14 = arith.constant 0 : index
    %c0_15 = arith.constant 0 : index
    %24 = vector.load %arg4[%c2, %c0_14, %c0_15] : memref<8x128x128xbf16, #tpu.memory_space<vmem>>, vector<1x128x128xbf16>
    %25 = vector.shape_cast %24 : vector<1x128x128xbf16> to vector<128x128xbf16>
    %cst_16 = arith.constant dense<0.000000e+00> : vector<16x128xf32>
    %26 = tpu.matmul %23, %25, %cst_16 {dimension_numbers = #tpu.dot_dimension_numbers<[1], [0], [0], [1], [0, 0, 1, 1], [], []>} : vector<16x128xbf16>, vector<128x128xbf16>, vector<16x128xf32> -> vector<16x128xf32>
    %27 = arith.addf %21, %26 : vector<16x128xf32>
    %28 = vector.extract_strided_slice %8 {offsets = [48, 0], sizes = [16, 128], strides = [1, 1]} : vector<128x128xf32> to vector<16x128xf32>
    %29 = arith.truncf %28 : vector<16x128xf32> to vector<16x128xbf16>
    %c3 = arith.constant 3 : index
    %c0_17 = arith.constant 0 : index
    %c0_18 = arith.constant 0 : index
    %30 = vector.load %arg4[%c3, %c0_17, %c0_18] : memref<8x128x128xbf16, #tpu.memory_space<vmem>>, vector<1x128x128xbf16>
    %31 = vector.shape_cast %30 : vector<1x128x128xbf16> to vector<128x128xbf16>
    %cst_19 = arith.constant dense<0.000000e+00> : vector<16x128xf32>
    %32 = tpu.matmul %29, %31, %cst_19 {dimension_numbers = #tpu.dot_dimension_numbers<[1], [0], [0], [1], [0, 0, 1, 1], [], []>} : vector<16x128xbf16>, vector<128x128xbf16>, vector<16x128xf32> -> vector<16x128xf32>
    %33 = arith.addf %27, %32 : vector<16x128xf32>
    %34 = vector.extract_strided_slice %8 {offsets = [64, 0], sizes = [16, 128], strides = [1, 1]} : vector<128x128xf32> to vector<16x128xf32>
    %35 = arith.truncf %34 : vector<16x128xf32> to vector<16x128xbf16>
    %c4 = arith.constant 4 : index
    %c0_20 = arith.constant 0 : index
    %c0_21 = arith.constant 0 : index
    %36 = vector.load %arg4[%c4, %c0_20, %c0_21] : memref<8x128x128xbf16, #tpu.memory_space<vmem>>, vector<1x128x128xbf16>
    %37 = vector.shape_cast %36 : vector<1x128x128xbf16> to vector<128x128xbf16>
    %cst_22 = arith.constant dense<0.000000e+00> : vector<16x128xf32>
    %38 = tpu.matmul %35, %37, %cst_22 {dimension_numbers = #tpu.dot_dimension_numbers<[1], [0], [0], [1], [0, 0, 1, 1], [], []>} : vector<16x128xbf16>, vector<128x128xbf16>, vector<16x128xf32> -> vector<16x128xf32>
    %39 = arith.addf %33, %38 : vector<16x128xf32>
    %40 = vector.extract_strided_slice %8 {offsets = [80, 0], sizes = [16, 128], strides = [1, 1]} : vector<128x128xf32> to vector<16x128xf32>
    %41 = arith.truncf %40 : vector<16x128xf32> to vector<16x128xbf16>
    %c5 = arith.constant 5 : index
    %c0_23 = arith.constant 0 : index
    %c0_24 = arith.constant 0 : index
    %42 = vector.load %arg4[%c5, %c0_23, %c0_24] : memref<8x128x128xbf16, #tpu.memory_space<vmem>>, vector<1x128x128xbf16>
    %43 = vector.shape_cast %42 : vector<1x128x128xbf16> to vector<128x128xbf16>
    %cst_25 = arith.constant dense<0.000000e+00> : vector<16x128xf32>
    %44 = tpu.matmul %41, %43, %cst_25 {dimension_numbers = #tpu.dot_dimension_numbers<[1], [0], [0], [1], [0, 0, 1, 1], [], []>} : vector<16x128xbf16>, vector<128x128xbf16>, vector<16x128xf32> -> vector<16x128xf32>
    %45 = arith.addf %39, %44 : vector<16x128xf32>
    %46 = vector.extract_strided_slice %8 {offsets = [96, 0], sizes = [16, 128], strides = [1, 1]} : vector<128x128xf32> to vector<16x128xf32>
    %47 = arith.truncf %46 : vector<16x128xf32> to vector<16x128xbf16>
    %c6 = arith.constant 6 : index
    %c0_26 = arith.constant 0 : index
    %c0_27 = arith.constant 0 : index
    %48 = vector.load %arg4[%c6, %c0_26, %c0_27] : memref<8x128x128xbf16, #tpu.memory_space<vmem>>, vector<1x128x128xbf16>
    %49 = vector.shape_cast %48 : vector<1x128x128xbf16> to vector<128x128xbf16>
    %cst_28 = arith.constant dense<0.000000e+00> : vector<16x128xf32>
    %50 = tpu.matmul %47, %49, %cst_28 {dimension_numbers = #tpu.dot_dimension_numbers<[1], [0], [0], [1], [0, 0, 1, 1], [], []>} : vector<16x128xbf16>, vector<128x128xbf16>, vector<16x128xf32> -> vector<16x128xf32>
    %51 = arith.addf %45, %50 : vector<16x128xf32>
    %52 = vector.extract_strided_slice %8 {offsets = [112, 0], sizes = [16, 128], strides = [1, 1]} : vector<128x128xf32> to vector<16x128xf32>
    %53 = arith.truncf %52 : vector<16x128xf32> to vector<16x128xbf16>
    %c7 = arith.constant 7 : index
    %c0_29 = arith.constant 0 : index
    %c0_30 = arith.constant 0 : index
    %54 = vector.load %arg4[%c7, %c0_29, %c0_30] : memref<8x128x128xbf16, #tpu.memory_space<vmem>>, vector<1x128x128xbf16>
    %55 = vector.shape_cast %54 : vector<1x128x128xbf16> to vector<128x128xbf16>
    %cst_31 = arith.constant dense<0.000000e+00> : vector<16x128xf32>
    %56 = tpu.matmul %53, %55, %cst_31 {dimension_numbers = #tpu.dot_dimension_numbers<[1], [0], [0], [1], [0, 0, 1, 1], [], []>} : vector<16x128xbf16>, vector<128x128xbf16>, vector<16x128xf32> -> vector<16x128xf32>
    %57 = arith.addf %51, %56 : vector<16x128xf32>
    %c0_32 = arith.constant 0 : index
    %c0_33 = arith.constant 0 : index
    %58 = vector.load %arg5[%c0_32, %c0_33] : memref<1x128xf32, #tpu.memory_space<vmem>>, vector<1x128xf32>
    %59 = vector.broadcast %58 : vector<1x128xf32> to vector<16x128xf32>
    %60 = arith.addf %57, %59 : vector<16x128xf32>
    %c0_34 = arith.constant 0 : index
    %c0_35 = arith.constant 0 : index
    %61 = vector.load %arg6[%c0_34, %c0_35] : memref<16x128xf32, #tpu.memory_space<vmem>>, vector<16x128xf32>
    tpu.vector_store %arg6[%c0_34, %c0_35], %60 {strides = array<i32>} : memref<16x128xf32, #tpu.memory_space<vmem>>, vector<16x128xf32>,
    return
  }
  func.func @transform_0(%arg0: i32) -> (i32, i32) {
    %c0_i32 = arith.constant 0 : i32
    %c0_i32_0 = arith.constant 0 : i32
    return %arg0, %c0_i32 : i32, i32
  }
  func.func @transform_1(%arg0: i32) -> (i32, i32) {
    %c0_i32 = arith.constant 0 : i32
    %c0_i32_0 = arith.constant 0 : i32
    %c0_i32_1 = arith.constant 0 : i32
    return %c0_i32, %c0_i32_0 : i32, i32
  }
  func.func @transform_2(%arg0: i32) -> (i32, i32) {
    %c0_i32 = arith.constant 0 : i32
    %c0_i32_0 = arith.constant 0 : i32
    %c0_i32_1 = arith.constant 0 : i32
    return %c0_i32, %c0_i32_0 : i32, i32
  }
  func.func @transform_3(%arg0: i32) -> (i32, i32, i32) {
    %c0_i32 = arith.constant 0 : i32
    %c0_i32_0 = arith.constant 0 : i32
    %c0_i32_1 = arith.constant 0 : i32
    %c0_i32_2 = arith.constant 0 : i32
    return %c0_i32, %c0_i32_0, %c0_i32_1 : i32, i32, i32
  }
  func.func @transform_4(%arg0: i32) -> (i32, i32) {
    %c0_i32 = arith.constant 0 : i32
    %c0_i32_0 = arith.constant 0 : i32
    %c0_i32_1 = arith.constant 0 : i32
    return %c0_i32, %c0_i32_0 : i32, i32
  }
  func.func @transform_5(%arg0: i32) -> (i32, i32) {
    %c0_i32 = arith.constant 0 : i32
    %c0_i32_0 = arith.constant 0 : i32
    return %arg0, %c0_i32 : i32, i32
  }
}

</mosaic_0001>

<bundles_post_ra>
// kernel: tpu_custom_call.1
= control target key start
LH: loop header
LB: loop body
LE: loop exit
PB: predicated region body
PF: predicated region fallthrough
CT: control target
= control target key end

     0   :  { %10 = vsyncpa [#allocation3], 0  ;;  %s1919_s0 = inlined_call_operand.hbm [shape: f32[128,128], index: 0, kind: input, shape index: {}]   ;;  %s1920_s1 = inlined_call_operand.hbm [shape: bf16[128,128], index: 1, kind: input, shape index: {}]   ;;  %s1921_s2 = inlined_call_operand.vmem [shape: f32[1,128], index: 2, kind: input, shape index: {}]   ;;  %s1922_s3 = inlined_call_operand.hbm [shape: bf16[8,128,128], index: 3, kind: input, shape index: {}]   ;;  %s1923_s4 = inlined_call_operand.vmem [shape: f32[1,128], index: 4, kind: input, shape index: {}]   ;;  %s1924_s5 = inlined_call_operand.hbm [shape: f32[16,128], index: 5, kind: output, shape index: {}]  }
   0x1   :  { %11 = vsyncpa [#allocation6], 0 }
   0x2   :  { %12 = vsyncpa [#allocation4], 0  ;;  %s1697_s18 = smov [#allocation5]   ;;  %s1603_s22 = scalar_lea.hbm %s1920_s1, 1024 }
   0x3   :  { %s30_s19 = sshll.u32 %s1697_s18, 4  ;;  %p1604_p0 = scmp.ne.s32.totalorder %s1920_s1, %s1603_s22  ;;  %s31_s19 = int_to_ptr.vmem [resolvable:$true] %s30_s19 }
   0x4   :  { %p1607_p1 = scmp.lt.u32.totalorder %s1603_s22, %s1920_s1 }
   0x6   :  { %p1609_p2 = pnand %p1607_p1, %p1604_p0 }
   0x8   :  { %1612 = shalt.err (!%p1609_p2)
}
   0x9   :  { %s1613_s27 = scalar_lea.vmem %s31_s19, 1024  ;;  %p1618_p4 = scmp.lt.s32.totalorder %s31_s19, %s31_s19 }
   0xa   :  { %p1614_p3 = scmp.ne.s32.totalorder %s31_s19, %s1613_s27  ;;  %p1619_p5 = scmp.lt.s32.totalorder %s1613_s27, %s1613_s27 }
   0xc   :  { %p1620_p6 = por %p1619_p5, %p1618_p4 }
   0xe   :  { %p1621_p7 = pnand %p1620_p6, %p1614_p3 }
  0x10   :  { %1624 = shalt.err (!%p1621_p7)
}
  0x11   :  { %s1698_s28 = smov 64   ;;  %s1699_s29 = smov 4  }
  0x12   :  { %36 = dma.hbm_to_vmem [thread:$0]  %s1920_s1, 1024, %s31_s19, [#allocation6], %s1698_s28, %s1698_s28, %s1699_s29  }
  0x13   :  { %s1700_s7 = smov [#allocation2]   ;;  %s1625_s11 = scalar_lea.hbm %s1919_s0, 2048 }
  0x14   :  { %s18_s8 = sshll.u32 %s1700_s7, 4  ;;  %p1626_p8 = scmp.ne.s32.totalorder %s1919_s0, %s1625_s11  ;;  %s19_s8 = int_to_ptr.vmem [resolvable:$true] %s18_s8 }
  0x15   :  { %p1629_p9 = scmp.lt.u32.totalorder %s1625_s11, %s1919_s0 }
  0x17   :  { %p1631_p10 = pnand %p1629_p9, %p1626_p8 }
  0x19   :  { %1634 = shalt.err (!%p1631_p10)
}
  0x1a   :  { %s1635_s16 = scalar_lea.vmem %s19_s8, 2048  ;;  %p1640_p12 = scmp.lt.s32.totalorder %s19_s8, %s19_s8 }
  0x1b   :  { %p1636_p11 = scmp.ne.s32.totalorder %s19_s8, %s1635_s16  ;;  %p1641_p13 = scmp.lt.s32.totalorder %s1635_s16, %s1635_s16 }
  0x1d   :  { %p1642_p0 = por %p1641_p13, %p1640_p12 }
  0x1f   :  { %p1643_p1 = pnand %p1642_p0, %p1636_p11 }
  0x21   :  { %1646 = shalt.err (!%p1643_p1)
}
  0x22   :  { %s1701_s1 = smov 128   ;;  %s1702_s17 = smov 8  }
  0x23   :  { %24 = dma.hbm_to_vmem [thread:$0]  %s1919_s0, 2048, %s19_s8, [#allocation3], %s1701_s1, %s1701_s1, %s1702_s17  }
  0x24   :  { %s1703_s20 = smov [#allocation7]   ;;  %s1647_s24 = scalar_lea.hbm %s1922_s3, 8192 }
  0x25   :  { %s44_s21 = sshll.u32 %s1703_s20, 4  ;;  %p1648_p2 = scmp.ne.s32.totalorder %s1922_s3, %s1647_s24  ;;  %s45_s21 = int_to_ptr.vmem [resolvable:$true] %s44_s21 }
  0x26   :  { %p1651_p3 = scmp.lt.u32.totalorder %s1647_s24, %s1922_s3 }
  0x28   :  { %p1653_p4 = pnand %p1651_p3, %p1648_p2 }
  0x2a   :  { %1656 = shalt.err (!%p1653_p4)
}
  0x2b   :  { %s1657_s6 = scalar_lea.vmem %s45_s21, 8192  ;;  %p1662_p6 = scmp.lt.s32.totalorder %s45_s21, %s45_s21 }
  0x2c   :  { %p1658_p5 = scmp.ne.s32.totalorder %s45_s21, %s1657_s6  ;;  %p1663_p7 = scmp.lt.s32.totalorder %s1657_s6, %s1657_s6 }
  0x2e   :  { %p1664_p8 = por %p1663_p7, %p1662_p6 }
  0x30   :  { %p1665_p9 = pnand %p1664_p8, %p1658_p5 }
  0x32   :  { %1668 = shalt.err (!%p1665_p9)
}
  0x33   :  { %50 = dma.hbm_to_vmem [thread:$0]  %s1922_s3, 8192, %s45_s21, [#allocation6], %s1698_s28, %s1698_s28, %s1699_s29  }
  0x34   :  { %1691 = dma.done.wait [#allocation3], 2048  }
  0x35   :  { %1692 = vsyncadd [#allocation3], 4294965248 }
  0x36   :  { %1693 = dma.done.wait [#allocation6], 9216  }
  0x37   :  { %1694 = vsyncadd [#allocation6], 4294958080  ;;  %v1704_v0 = vmov 0.0   ;;  %v1531_v1 = vld [vmem:[#allocation5] sm:$0xff]   ;;  %v1532_v2 = vld [vmem:[#allocation5 + $0x8] sm:$0xff]   ;;  %vm1705_vm0 = vmmov 0  }
  0x38   :  { %1361 = vmatprep.subr.bf16.mxu1 %v1704_v0  ;;  %1329 = vmatprep.subr.bf16.mxu0 %v1531_v1  ;;  %v1533_v3 = vld [vmem:[#allocation5 + $0x10] sm:$0xff]   ;;  %v1534_v4 = vld [vmem:[#allocation5 + $0x18] sm:$0xff]   ;;  %v63_v5 = vld [vmem:[#allocation2] sm:$0xff]  ;;  %s1706_s8 = smov [#allocation8]  }
  0x39   :  { %1330 = vmatpush3.bf16.msra.mxu0 %v1531_v1  ;;  %v64_v6 = vld [vmem:[#allocation2 + $0x8] sm:$0xff]  ;;  %v1535_v8 = vld [vmem:[#allocation5 + $0x20] sm:$0xff]   ;;  %v1537_v12 = vld [vmem:[#allocation5 + $0x30] sm:$0xff]   ;;  %1377 = vmatprep.mubr.msk.bf16.mxu1 %vm1705_vm0, %v1704_v0  ;;  %s1154_s9 = sshll.u32 %s1706_s8, 4  ;;  %s1155_s9 = int_to_ptr.vmem [resolvable:$true] %s1154_s9 }
  0x3a   :  { %1331 = vmatprep.subr.bf16.mxu0 %v1532_v2  ;;  %v79_v7 = vpack.c.bf16 %v64_v6, %v63_v5  ;;  %v1539_v9 = vld [vmem:[#allocation7 + $0x40] sm:$0xff]   ;;  %v1536_v10 = vld [vmem:[#allocation5 + $0x28] sm:$0xff]   ;;  %v1543_v13 = vld [vmem:[#allocation7 + $0x50] sm:$0xff]   ;;  %s1669_s10 = scalar_lea.vmem %s1155_s9, 256  ;;  %p1674_p11 = scmp.lt.s32.totalorder %s1155_s9, %s1155_s9 }
  0x3b   :  { %1362 = vmatpush3.bf16.msra.mxu1 %v1539_v9  ;;  %v1541_v11 = vld [vmem:[#allocation7 + $0x48] sm:$0xff]   ;;  %v1538_v14 = vld [vmem:[#allocation5 + $0x38] sm:$0xff]   ;;  %v65_v16 = vld [vmem:[#allocation2 + $0x10] sm:$0xff]  ;;  %p1670_p10 = scmp.ne.s32.totalorder %s1155_s9, %s1669_s10  ;;  %p1675_p12 = scmp.lt.s32.totalorder %s1669_s10, %s1669_s10 }
  0x3c   :  { %1345 = vmatprep.mubr.bf16.mxu0 %v79_v7  ;;  %1363 = vmatprep.subr.bf16.mxu1 %v1704_v0  ;;  %v1545_v15 = vld [vmem:[#allocation7 + $0x58] sm:$0xff]   ;;  %v67_v18 = vld [vmem:[#allocation2 + $0x20] sm:$0xff]  ;;  %v68_v19 = vld [vmem:[#allocation2 + $0x28] sm:$0xff] }
  0x3d   :  { %1332 = vmatpush3.bf16.msra.mxu0 %v1532_v2  ;;  %v66_v17 = vld [vmem:[#allocation2 + $0x18] sm:$0xff]  ;;  %v1547_v20 = vld [vmem:[#allocation7 + $0x60] sm:$0xff]   ;;  %v1549_v23 = vld [vmem:[#allocation7 + $0x68] sm:$0xff]   ;;  %v81_v24 = vpack.c.bf16 %v68_v19, %v67_v18  ;;  %p1676_p13 = por %p1675_p12, %p1674_p11 }
  0x3e   :  { %1333 = vmatprep.subr.bf16.mxu0 %v1533_v3  ;;  %v1540_v21 = vld [vmem:[#allocation7] sm:$0xff]   ;;  %v80_v22 = vpack.c.bf16 %v66_v17, %v65_v16  ;;  %v69_v25 = vld [vmem:[#allocation2 + $0x30] sm:$0xff]  ;;  %v70_v26 = vld [vmem:[#allocation2 + $0x38] sm:$0xff] }
  0x3f   :  { %1364 = vmatpush3.bf16.msra.mxu1 %v1541_v11  ;;  %v1542_v27 = vld [vmem:[#allocation7 + $0x8] sm:$0xff]   ;;  %v71_v28 = vld [vmem:[#allocation2 + $0x40] sm:$0xff]  ;;  %v1544_v30 = vld [vmem:[#allocation7 + $0x10] sm:$0xff]   ;;  %v82_v31 = vpack.c.bf16 %v70_v26, %v69_v25  ;;  %p1677_p0 = pnand %p1676_p13, %p1670_p10 }
  0x40   :  { %1365 = vmatprep.subr.bf16.mxu1 %v1704_v0  ;;  %v72_v29 = vld [vmem:[#allocation2 + $0x48] sm:$0xff]  ;;  %v73_v33 = vld [vmem:[#allocation2 + $0x50] sm:$0xff]  ;;  %v74_v34 = vld [vmem:[#allocation2 + $0x58] sm:$0xff] }
  0x41   :  { %1334 = vmatpush3.bf16.msra.mxu0 %v1533_v3  ;;  %v83_v32 = vpack.c.bf16 %v72_v29, %v71_v28  ;;  %v1546_v35 = vld [vmem:[#allocation7 + $0x18] sm:$0xff]   ;;  %v75_v36 = vld [vmem:[#allocation2 + $0x60] sm:$0xff]  ;;  %v76_v37 = vld [vmem:[#allocation2 + $0x68] sm:$0xff]  ;;  %v84_v39 = vpack.c.bf16 %v74_v34, %v73_v33 }
  0x42   :  { %1335 = vmatprep.subr.bf16.mxu0 %v1534_v4  ;;  %v1548_v38 = vld [vmem:[#allocation7 + $0x20] sm:$0xff]   ;;  %v85_v40 = vpack.c.bf16 %v76_v37, %v75_v36  ;;  %v77_v41 = vld [vmem:[#allocation2 + $0x70] sm:$0xff]  ;;  %v78_v42 = vld [vmem:[#allocation2 + $0x78] sm:$0xff] }
  0x43   :  { %1366 = vmatpush3.bf16.msra.mxu1 %v1543_v13  ;;  %v1550_v43 = vld [vmem:[#allocation7 + $0x28] sm:$0xff]   ;;  %v86_v44 = vpack.c.bf16 %v78_v42, %v77_v41  ;;  %v1551_v45 = vld [vmem:[#allocation7 + $0x70] sm:$0xff]   ;;  %v1553_v47 = vld [vmem:[#allocation7 + $0x78] sm:$0xff]  }
  0x44   :  { %1367 = vmatprep.subr.bf16.mxu1 %v1704_v0  ;;  %v1552_v46 = vld [vmem:[#allocation7 + $0x30] sm:$0xff]   ;;  %v1554_v48 = vld [vmem:[#allocation7 + $0x38] sm:$0xff]   ;;  %v1807_v49 = vld [vmem:[%s1921_s2] ss:$0 sm:$0xff] }
  0x45   :  { %1336 = vmatpush3.bf16.msra.mxu0 %v1534_v4  ;;  %v1555_v62 = vld [vmem:[#allocation7 + $0x80] sm:$0xff]   ;;  %v1557_v6 = vld [vmem:[#allocation7 + $0x88] sm:$0xff]   ;;  %v1559_v16 = vld [vmem:[#allocation7 + $0x90] sm:$0xff]  }
  0x46   :  { %1337 = vmatprep.subr.bf16.mxu0 %v1535_v8  ;;  %v1556_v1 = vld [vmem:[#allocation7 + $0xc0] sm:$0xff]   ;;  %v1558_v9 = vld [vmem:[#allocation7 + $0xc8] sm:$0xff]   ;;  %v1560_v18 = vld [vmem:[#allocation7 + $0xd0] sm:$0xff]  }
  0x47   :  { %1368 = vmatpush3.bf16.msra.mxu1 %v1545_v15  ;;  %v1563_v34 = vld [vmem:[#allocation7 + $0xa0] sm:$0xff]   ;;  %v1565_v42 = vld [vmem:[#allocation7 + $0xa8] sm:$0xff]  }
  0x48   :  { %1369 = vmatprep.subr.bf16.mxu1 %v1704_v0  ;;  %v1564_v36 = vld [vmem:[#allocation7 + $0xe0] sm:$0xff]  }
  0x49   :  { %1338 = vmatpush3.bf16.msra.mxu0 %v1535_v8 }
  0x4a   :  { %1339 = vmatprep.subr.bf16.mxu0 %v1536_v10 }
  0x4b   :  { %1370 = vmatpush3.bf16.msra.mxu1 %v1547_v20 }
  0x4c   :  { %1371 = vmatprep.subr.bf16.mxu1 %v1704_v0 }
  0x4d   :  { %1340 = vmatpush3.bf16.msra.mxu0 %v1536_v10 }
  0x4e   :  { %1341 = vmatprep.subr.bf16.mxu0 %v1537_v12 }
  0x4f   :  { %1372 = vmatpush3.bf16.msra.mxu1 %v1549_v23 }
  0x50   :  { %1373 = vmatprep.subr.bf16.mxu1 %v1704_v0 }
  0x51   :  { %1342 = vmatpush3.bf16.msra.mxu0 %v1537_v12 }
  0x52   :  { %1343 = vmatprep.subr.bf16.mxu0 %v1538_v14 }
  0x53   :  { %1374 = vmatpush3.bf16.msra.mxu1 %v1551_v45  ;;  %v1566_v45 = vld [vmem:[#allocation7 + $0xe8] sm:$0xff]  }
  0x54   :  { %1375 = vmatprep.subr.bf16.mxu1 %v1704_v0 }
  0x55   :  { %1344 = vmatpush3.bf16.msra.mxu0 %v1538_v14 }
  0x56   :  { %1381 = vmatprep.subr.bf16.mxu0 %v1704_v0 }
  0x57   :  { %1376 = vmatpush3.bf16.msra.mxu1 %v1553_v47 }
  0x58   :  { %1346 = vmatmul.mubr.bf16.vlgmr.msra.gmra.mrb[0].mxu0 %v80_v22  ;;  %1401 = vmatprep.subr.bf16.mxu1 %v1704_v0 }
  0x59   :  { %1349 = vmatprep.mubr.bf16.mxu0 %v81_v24  ;;  %1382 = vmatpush3.bf16.msra.mxu0 %v1540_v21  ;;  %v1561_v24 = vld [vmem:[#allocation7 + $0x98] sm:$0xff]  }
  0x5a   :  { %1383 = vmatprep.subr.bf16.mxu0 %v1704_v0 }
  0x5d   :  { %1384 = vmatpush3.bf16.msra.mxu0 %v1542_v27  ;;  %v1562_v27 = vld [vmem:[#allocation7 + $0xd8] sm:$0xff]  }
  0x5e   :  { %1385 = vmatprep.subr.bf16.mxu0 %v1704_v0 }
  0x60   :  { %1350 = vmatmul.mubr.bf16.gmra.mrb[4].mxu0 %v82_v31 }
  0x61   :  { %1353 = vmatprep.mubr.bf16.mxu0 %v83_v32  ;;  %1386 = vmatpush3.bf16.msra.mxu0 %v1544_v30 }
  0x62   :  { %1387 = vmatprep.subr.bf16.mxu0 %v1704_v0 }
  0x65   :  { %1388 = vmatpush3.bf16.msra.mxu0 %v1546_v35 }
  0x66   :  { %1389 = vmatprep.subr.bf16.mxu0 %v1704_v0 }
  0x68   :  { %1354 = vmatmul.mubr.bf16.gmra.mrb[8].mxu0 %v84_v39 }
  0x69   :  { %1357 = vmatprep.mubr.bf16.mxu0 %v85_v40  ;;  %1390 = vmatpush3.bf16.msra.mxu0 %v1548_v38 }
  0x6a   :  { %1391 = vmatprep.subr.bf16.mxu0 %v1704_v0 }
  0x6d   :  { %1392 = vmatpush3.bf16.msra.mxu0 %v1550_v43 }
  0x6e   :  { %1393 = vmatprep.subr.bf16.mxu0 %v1704_v0 }
  0x70   :  { %1358 = vmatmul.mubr.bf16.gmra.mrb[12].mxu0 %v86_v44 }
  0x71   :  { %1394 = vmatpush3.bf16.msra.mxu0 %v1552_v46  ;;  %1397 = vmatprep.mubr.msk.bf16.mxu0 %vm1705_vm0, %v1704_v0 }
  0x72   :  { %1395 = vmatprep.subr.bf16.mxu0 %v1704_v0 }
  0x75   :  { %1396 = vmatpush3.bf16.msra.mxu0 %v1554_v48 }
  0x76   :  { %1421 = vmatprep.subr.bf16.mxu0 %v1704_v0 }
 0x12b   :  { %v1347_v50 = vpop.f32.mrb[0].mxu0 }
 0x12c   :  { %v201_v51 = vadd.f32 %v1347_v50, %v1807_v49  ;;  %v192_v52 = vpop.f32.mrb[1].mxu0 }
 0x12d   :  { %v193_v53 = vadd.f32 %v1807_v49, %v192_v52  ;;  %v1348_v54 = vpop.f32.mrb[2].mxu0 }
 0x12e   :  { %v204_v55 = vadd.f32 %v1348_v54, %v1807_v49  ;;  %v195_v56 = vpop.f32.mrb[3].mxu0  ;;  %v257_v58 = vmax.f32 %v201_v51, 0.0 }
 0x12f   :  { %v196_v57 = vadd.f32 %v1807_v49, %v195_v56  ;;  %v255_v60 = vmax.f32 %v193_v53, 0.0  ;;  %v1567_v53 = vld [vmem:[#allocation7 + $0xb0] sm:$0xff]  }
 0x130   :  { %v258_v59 = vmax.f32 %v204_v55, 0.0  ;;  %v1568_v55 = vld [vmem:[#allocation7 + $0xf0] sm:$0xff]  }
 0x131   :  { %v256_v61 = vmax.f32 %v196_v57, 0.0 }
 0x132   :  { %v288_v63 = vpack.c.bf16 %v258_v59, %v257_v58  ;;  %v1569_v58 = vld [vmem:[#allocation7 + $0xb8] sm:$0xff]   ;;  %v1571_v59 = vld [vmem:[#allocation7 + $0x100] sm:$0xff]  }
 0x133   :  { %v271_v2 = vpack.c.bf16 %v256_v61, %v255_v60  ;;  %v1351_v3 = vpop.f32.mrb[4].mxu0  ;;  %v1572_v60 = vld [vmem:[#allocation7 + $0x140] sm:$0xff]   ;;  %v1573_v61 = vld [vmem:[#allocation7 + $0x108] sm:$0xff]  }
 0x134   :  { %1378 = vmatmul.mubr.bf16.vlgmr.msra.gmra.mrb[0].mxu1 %v288_v63  ;;  %v217_v4 = vadd.f32 %v1351_v3, %v1807_v49  ;;  %v208_v5 = vpop.f32.mrb[5].mxu0  ;;  %v1575_v63 = vld [vmem:[#allocation7 + $0x110] sm:$0xff]   ;;  %v1578_v3 = vld [vmem:[#allocation7 + $0x158] sm:$0xff]  }
 0x135   :  { %1402 = vmatpush3.bf16.msra.mxu1 %v1555_v62  ;;  %1398 = vmatmul.mubr.bf16.vlgmr.msra.gmra.mrb[16].mxu0 %v271_v2  ;;  %v209_v7 = vadd.f32 %v1807_v49, %v208_v5  ;;  %v1352_v8 = vpop.f32.mrb[6].mxu0  ;;  %v1574_v62 = vld [vmem:[#allocation7 + $0x148] sm:$0xff]   ;;  %v1577_v2 = vld [vmem:[#allocation7 + $0x118] sm:$0xff]   ;;  %v1580_v5 = vld [vmem:[#allocation7 + $0x160] sm:$0xff]  }
 0x136   :  { %1422 = vmatpush3.bf16.msra.mxu0 %v1556_v1  ;;  %1403 = vmatprep.subr.bf16.mxu1 %v1704_v0  ;;  %v261_v10 = vmax.f32 %v217_v4, 0.0  ;;  %v220_v11 = vadd.f32 %v1352_v8, %v1807_v49  ;;  %v211_v12 = vpop.f32.mrb[7].mxu0  ;;  %v1576_v1 = vld [vmem:[#allocation7 + $0x150] sm:$0xff]   ;;  %v1579_v4 = vld [vmem:[#allocation7 + $0x120] sm:$0xff]  }
 0x137   :  { %1423 = vmatprep.subr.bf16.mxu0 %v1704_v0  ;;  %v259_v13 = vmax.f32 %v209_v7, 0.0  ;;  %v212_v14 = vadd.f32 %v1807_v49, %v211_v12  ;;  %1417 = vmatprep.mubr.msk.bf16.mxu1 %vm1705_vm0, %v1704_v0  ;;  %v1582_v7 = vld [vmem:[#allocation7 + $0x168] sm:$0xff]   ;;  %v1583_v8 = vld [vmem:[#allocation7 + $0x130] sm:$0xff]   ;;  %v1587_v12 = vld [vmem:[#allocation7 + $0x180] sm:$0xff]  }
 0x138   :  { %v262_v15 = vmax.f32 %v220_v11, 0.0  ;;  %1437 = vmatprep.mubr.msk.bf16.mxu0 %vm1705_vm0, %v1704_v0  ;;  %v1586_v11 = vld [vmem:[#allocation7 + $0x178] sm:$0xff]  }
 0x139   :  { %1404 = vmatpush3.bf16.msra.mxu1 %v1557_v6  ;;  %v260_v17 = vmax.f32 %v212_v14, 0.0  ;;  %v1581_v6 = vld [vmem:[#allocation7 + $0x128] sm:$0xff]  }
 0x13a   :  { %1424 = vmatpush3.bf16.msra.mxu0 %v1558_v9  ;;  %1405 = vmatprep.subr.bf16.mxu1 %v1704_v0  ;;  %v1824_v19 = vpack.c.bf16 %v262_v15, %v261_v10  ;;  %v1584_v9 = vld [vmem:[#allocation7 + $0x170] sm:$0xff]   ;;  %v1585_v10 = vld [vmem:[#allocation7 + $0x138] sm:$0xff]   ;;  %v1589_v14 = vld [vmem:[#allocation7 + $0x188] sm:$0xff]  }
 0x13b   :  { %1425 = vmatprep.subr.bf16.mxu0 %v1704_v0  ;;  %v1827_v20 = vpack.c.bf16 %v260_v17, %v259_v13  ;;  %v1355_v21 = vpop.f32.mrb[8].mxu0  ;;  %v1588_v13 = vld [vmem:[#allocation7 + $0x1c0] sm:$0xff]   ;;  %v1590_v15 = vld [vmem:[#allocation7 + $0x1c8] sm:$0xff]   ;;  %v1592_v17 = vld [vmem:[#allocation7 + $0x1d0] sm:$0xff]  }
 0x13c   :  { %v233_v22 = vadd.f32 %v1355_v21, %v1807_v49  ;;  %v224_v23 = vpop.f32.mrb[9].mxu0  ;;  %v1596_v21 = vld [vmem:[#allocation7 + $0x1e0] sm:$0xff]  }
 0x13d   :  { %1406 = vmatpush3.bf16.msra.mxu1 %v1559_v16  ;;  %v225_v25 = vadd.f32 %v1807_v49, %v224_v23  ;;  %v1356_v26 = vpop.f32.mrb[10].mxu0  ;;  %v1591_v16 = vld [vmem:[#allocation7 + $0x190] sm:$0xff]   ;;  %v1598_v23 = vld [vmem:[#allocation7 + $0x1e8] sm:$0xff]  }
 0x13e   :  { %1426 = vmatpush3.bf16.msra.mxu0 %v1560_v18  ;;  %1407 = vmatprep.subr.bf16.mxu1 %v1704_v0  ;;  %v265_v28 = vmax.f32 %v233_v22, 0.0  ;;  %v236_v29 = vadd.f32 %v1356_v26, %v1807_v49  ;;  %v227_v30 = vpop.f32.mrb[11].mxu0  ;;  %v1593_v18 = vld [vmem:[#allocation7 + $0x198] sm:$0xff]   ;;  %v1597_v22 = vld [vmem:[#allocation7 + $0x1a8] sm:$0xff]  }
 0x13f   :  { %1427 = vmatprep.subr.bf16.mxu0 %v1704_v0  ;;  %v263_v31 = vmax.f32 %v225_v25, 0.0  ;;  %v228_v32 = vadd.f32 %v1807_v49, %v227_v30  ;;  %v1600_v25 = vld [vmem:[#allocation7 + $0x1f0] sm:$0xff]   ;;  %v1601_v26 = vld [vmem:[#allocation7 + $0x1b8] sm:$0xff]  }
 0x140   :  { %v266_v33 = vmax.f32 %v236_v29, 0.0 }
 0x141   :  { %1408 = vmatpush3.bf16.msra.mxu1 %v1561_v24  ;;  %v264_v35 = vmax.f32 %v228_v32, 0.0  ;;  %v1599_v24 = vld [vmem:[#allocation7 + $0x1b0] sm:$0xff]  }
 0x142   :  { %1428 = vmatpush3.bf16.msra.mxu0 %v1562_v27  ;;  %1409 = vmatprep.subr.bf16.mxu1 %v1704_v0  ;;  %v1836_v37 = vpack.c.bf16 %v266_v33, %v265_v28  ;;  %v1602_v27 = vld [vmem:[#allocation7 + $0x1f8] sm:$0xff]  }
 0x143   :  { %1429 = vmatprep.subr.bf16.mxu0 %v1704_v0  ;;  %v1839_v38 = vpack.c.bf16 %v264_v35, %v263_v31  ;;  %v1359_v39 = vpop.f32.mrb[12].mxu0 }
 0x144   :  { %v249_v40 = vadd.f32 %v1359_v39, %v1807_v49  ;;  %v240_v41 = vpop.f32.mrb[13].mxu0 }
 0x145   :  { %1410 = vmatpush3.bf16.msra.mxu1 %v1563_v34  ;;  %v241_v43 = vadd.f32 %v1807_v49, %v240_v41  ;;  %v1360_v44 = vpop.f32.mrb[14].mxu0 }
 0x146   :  { %1430 = vmatpush3.bf16.msra.mxu0 %v1564_v36  ;;  %1411 = vmatprep.subr.bf16.mxu1 %v1704_v0  ;;  %v269_v46 = vmax.f32 %v249_v40, 0.0  ;;  %v252_v47 = vadd.f32 %v1360_v44, %v1807_v49  ;;  %v243_v48 = vpop.f32.mrb[15].mxu0 }
 0x147   :  { %1431 = vmatprep.subr.bf16.mxu0 %v1704_v0  ;;  %v267_v50 = vmax.f32 %v241_v43, 0.0  ;;  %v244_v51 = vadd.f32 %v1807_v49, %v243_v48  ;;  %v1570_v49 = vld [vmem:[#allocation7 + $0xf8] sm:$0xff]  }
 0x148   :  { %v270_v52 = vmax.f32 %v252_v47, 0.0 }
 0x149   :  { %1412 = vmatpush3.bf16.msra.mxu1 %v1565_v42  ;;  %v268_v54 = vmax.f32 %v244_v51, 0.0 }
 0x14a   :  { %1432 = vmatpush3.bf16.msra.mxu0 %v1566_v45  ;;  %1413 = vmatprep.subr.bf16.mxu1 %v1704_v0  ;;  %v1848_v56 = vpack.c.bf16 %v270_v52, %v269_v46 }
 0x14b   :  { %1433 = vmatprep.subr.bf16.mxu0 %v1704_v0  ;;  %v1851_v57 = vpack.c.bf16 %v268_v54, %v267_v50 }
 0x14d   :  { %1414 = vmatpush3.bf16.msra.mxu1 %v1567_v53 }
 0x14e   :  { %1434 = vmatpush3.bf16.msra.mxu0 %v1568_v55  ;;  %1415 = vmatprep.subr.bf16.mxu1 %v1704_v0 }
 0x14f   :  { %1435 = vmatprep.subr.bf16.mxu0 %v1704_v0 }
 0x151   :  { %1416 = vmatpush3.bf16.msra.mxu1 %v1569_v58 }
 0x152   :  { %1436 = vmatpush3.bf16.msra.mxu0 %v1570_v49  ;;  %1441 = vmatprep.subr.bf16.mxu1 %v1704_v0 }
 0x153   :  { %1461 = vmatprep.subr.bf16.mxu0 %v1704_v0 }
 0x154   :  { %1418 = vmatmul.mubr.bf16.vlgmr.msra.gmra.mrb[4].mxu1 %v1827_v20  ;;  %v1595_v20 = vld [vmem:[#allocation7 + $0x1a0] sm:$0xff]  }
 0x155   :  { %1438 = vmatmul.mubr.bf16.vlgmr.msra.gmra.mrb[20].mxu0 %v1824_v19  ;;  %1442 = vmatpush3.bf16.msra.mxu1 %v1571_v59  ;;  %v1594_v19 = vld [vmem:[#allocation7 + $0x1d8] sm:$0xff]  }
 0x156   :  { %1462 = vmatpush3.bf16.msra.mxu0 %v1572_v60  ;;  %1443 = vmatprep.subr.bf16.mxu1 %v1704_v0 }
 0x157   :  { %1463 = vmatprep.subr.bf16.mxu0 %v1704_v0  ;;  %1457 = vmatprep.mubr.msk.bf16.mxu1 %vm1705_vm0, %v1704_v0 }
 0x158   :  { %1477 = vmatprep.mubr.msk.bf16.mxu0 %vm1705_vm0, %v1704_v0 }
 0x159   :  { %1444 = vmatpush3.bf16.msra.mxu1 %v1573_v61 }
 0x15a   :  { %1464 = vmatpush3.bf16.msra.mxu0 %v1574_v62  ;;  %1445 = vmatprep.subr.bf16.mxu1 %v1704_v0 }
 0x15b   :  { %1465 = vmatprep.subr.bf16.mxu0 %v1704_v0 }
 0x15d   :  { %1446 = vmatpush3.bf16.msra.mxu1 %v1575_v63 }
 0x15e   :  { %1466 = vmatpush3.bf16.msra.mxu0 %v1576_v1  ;;  %1447 = vmatprep.subr.bf16.mxu1 %v1704_v0 }
 0x15f   :  { %1467 = vmatprep.subr.bf16.mxu0 %v1704_v0 }
 0x161   :  { %1448 = vmatpush3.bf16.msra.mxu1 %v1577_v2  ;;  %v1240_v2 = vld [vmem:[%s1923_s4] ss:$0 sm:$0xff] }
 0x162   :  { %1468 = vmatpush3.bf16.msra.mxu0 %v1578_v3  ;;  %1449 = vmatprep.subr.bf16.mxu1 %v1704_v0 }
 0x163   :  { %1469 = vmatprep.subr.bf16.mxu0 %v1704_v0 }
 0x165   :  { %1450 = vmatpush3.bf16.msra.mxu1 %v1579_v4 }
 0x166   :  { %1470 = vmatpush3.bf16.msra.mxu0 %v1580_v5  ;;  %1451 = vmatprep.subr.bf16.mxu1 %v1704_v0 }
 0x167   :  { %1471 = vmatprep.subr.bf16.mxu0 %v1704_v0 }
 0x169   :  { %1452 = vmatpush3.bf16.msra.mxu1 %v1581_v6 }
 0x16a   :  { %1472 = vmatpush3.bf16.msra.mxu0 %v1582_v7  ;;  %1453 = vmatprep.subr.bf16.mxu1 %v1704_v0 }
 0x16b   :  { %1473 = vmatprep.subr.bf16.mxu0 %v1704_v0 }
 0x16d   :  { %1454 = vmatpush3.bf16.msra.mxu1 %v1583_v8 }
 0x16e   :  { %1474 = vmatpush3.bf16.msra.mxu0 %v1584_v9  ;;  %1455 = vmatprep.subr.bf16.mxu1 %v1704_v0 }
 0x16f   :  { %1475 = vmatprep.subr.bf16.mxu0 %v1704_v0 }
 0x171   :  { %1456 = vmatpush3.bf16.msra.mxu1 %v1585_v10 }
 0x172   :  { %1476 = vmatpush3.bf16.msra.mxu0 %v1586_v11  ;;  %1481 = vmatprep.subr.bf16.mxu1 %v1704_v0 }
 0x173   :  { %1501 = vmatprep.subr.bf16.mxu0 %v1704_v0 }
 0x174   :  { %1458 = vmatmul.mubr.bf16.vlgmr.msra.gmra.mrb[8].mxu1 %v1839_v38 }
 0x175   :  { %1478 = vmatmul.mubr.bf16.vlgmr.msra.gmra.mrb[24].mxu0 %v1836_v37  ;;  %1482 = vmatpush3.bf16.msra.mxu1 %v1587_v12 }
 0x176   :  { %1502 = vmatpush3.bf16.msra.mxu0 %v1588_v13  ;;  %1483 = vmatprep.subr.bf16.mxu1 %v1704_v0 }
 0x177   :  { %1503 = vmatprep.subr.bf16.mxu0 %v1704_v0  ;;  %1497 = vmatprep.mubr.msk.bf16.mxu1 %vm1705_vm0, %v1704_v0 }
 0x178   :  { %1517 = vmatprep.mubr.msk.bf16.mxu0 %vm1705_vm0, %v1704_v0 }
 0x179   :  { %1484 = vmatpush3.bf16.msra.mxu1 %v1589_v14 }
 0x17a   :  { %1504 = vmatpush3.bf16.msra.mxu0 %v1590_v15  ;;  %1485 = vmatprep.subr.bf16.mxu1 %v1704_v0 }
 0x17b   :  { %1505 = vmatprep.subr.bf16.mxu0 %v1704_v0 }
 0x17d   :  { %1486 = vmatpush3.bf16.msra.mxu1 %v1591_v16 }
 0x17e   :  { %1506 = vmatpush3.bf16.msra.mxu0 %v1592_v17  ;;  %1487 = vmatprep.subr.bf16.mxu1 %v1704_v0 }
 0x17f   :  { %1507 = vmatprep.subr.bf16.mxu0 %v1704_v0 }
 0x181   :  { %1488 = vmatpush3.bf16.msra.mxu1 %v1593_v18 }
 0x182   :  { %1508 = vmatpush3.bf16.msra.mxu0 %v1594_v19  ;;  %1489 = vmatprep.subr.bf16.mxu1 %v1704_v0 }
 0x183   :  { %1509 = vmatprep.subr.bf16.mxu0 %v1704_v0 }
 0x185   :  { %1490 = vmatpush3.bf16.msra.mxu1 %v1595_v20 }
 0x186   :  { %1510 = vmatpush3.bf16.msra.mxu0 %v1596_v21  ;;  %1491 = vmatprep.subr.bf16.mxu1 %v1704_v0 }
 0x187   :  { %1511 = vmatprep.subr.bf16.mxu0 %v1704_v0 }
 0x189   :  { %1492 = vmatpush3.bf16.msra.mxu1 %v1597_v22 }
 0x18a   :  { %1512 = vmatpush3.bf16.msra.mxu0 %v1598_v23  ;;  %1493 = vmatprep.subr.bf16.mxu1 %v1704_v0 }
 0x18b   :  { %1513 = vmatprep.subr.bf16.mxu0 %v1704_v0 }
 0x18d   :  { %1494 = vmatpush3.bf16.msra.mxu1 %v1599_v24 }
 0x18e   :  { %1514 = vmatpush3.bf16.msra.mxu0 %v1600_v25  ;;  %1495 = vmatprep.subr.bf16.mxu1 %v1704_v0 }
 0x18f   :  { %1515 = vmatprep.subr.bf16.mxu0 %v1704_v0 }
 0x191   :  { %1496 = vmatpush3.bf16.msra.mxu1 %v1601_v26 }
 0x192   :  { %1516 = vmatpush3.bf16.msra.mxu0 %v1602_v27 }
 0x194   :  { %1498 = vmatmul.mubr.bf16.vlgmr.msra.gmra.mrb[12].mxu1 %v1851_v57 }
 0x195   :  { %1518 = vmatmul.mubr.bf16.vlgmr.msra.gmra.mrb[28].mxu0 %v1848_v56 }
 0x207   :  { %v388_v28 = vpop.f32.mrb[0].mxu1 }
 0x208   :  { %v1379_v29 = vpop.f32.mrb[1].mxu1  ;;  %v477_v30 = vpop.f32.mrb[16].mxu0 }
 0x209   :  { %v478_v31 = vadd.f32 %v477_v30, %v388_v28  ;;  %v391_v32 = vpop.f32.mrb[2].mxu1  ;;  %v1399_v33 = vpop.f32.mrb[17].mxu0 }
 0x20a   :  { %v1380_v34 = vpop.f32.mrb[3].mxu1  ;;  %v480_v35 = vpop.f32.mrb[18].mxu0 }
 0x20b   :  { %v481_v36 = vadd.f32 %v480_v35, %v391_v32  ;;  %v1400_v37 = vpop.f32.mrb[19].mxu0 }
 0x227   :  { %v584_v38 = vpop.f32.mrb[4].mxu1 }
 0x228   :  { %v591_v39 = vadd.f32 %v584_v38, %v478_v31  ;;  %v1419_v40 = vpop.f32.mrb[5].mxu1  ;;  %v693_v0 = vpop.f32.mrb[20].mxu0 }
 0x229   :  { %v587_v41 = vpop.f32.mrb[6].mxu1  ;;  %v1439_v42 = vpop.f32.mrb[21].mxu0 }
 0x22a   :  { %v700_v43 = vadd.f32 %v693_v0, %v591_v39  ;;  %v592_v44 = vadd.f32 %v587_v41, %v481_v36  ;;  %v1420_v45 = vpop.f32.mrb[7].mxu1  ;;  %v696_v46 = vpop.f32.mrb[22].mxu0 }
 0x22b   :  { %v1440_v47 = vpop.f32.mrb[23].mxu0 }
 0x22c   :  { %v701_v48 = vadd.f32 %v696_v46, %v592_v44 }
 0x247   :  { %v802_v50 = vpop.f32.mrb[8].mxu1 }
 0x248   :  { %v809_v51 = vadd.f32 %v802_v50, %v700_v43  ;;  %v1459_v52 = vpop.f32.mrb[9].mxu1  ;;  %v911_v53 = vpop.f32.mrb[24].mxu0 }
 0x249   :  { %v805_v54 = vpop.f32.mrb[10].mxu1  ;;  %v1479_v55 = vpop.f32.mrb[25].mxu0 }
 0x24a   :  { %v918_v56 = vadd.f32 %v911_v53, %v809_v51  ;;  %v810_v57 = vadd.f32 %v805_v54, %v701_v48  ;;  %v1460_v58 = vpop.f32.mrb[11].mxu1  ;;  %v914_v49 = vpop.f32.mrb[26].mxu0 }
 0x24b   :  { %v1480_v59 = vpop.f32.mrb[27].mxu0 }
 0x24c   :  { %v919_v60 = vadd.f32 %v914_v49, %v810_v57 }
 0x267   :  { %v1020_v61 = vpop.f32.mrb[12].mxu1 }
 0x268   :  { %v1027_v62 = vadd.f32 %v1020_v61, %v918_v56  ;;  %v1499_v63 = vpop.f32.mrb[13].mxu1  ;;  %v1129_v1 = vpop.f32.mrb[28].mxu0 }
 0x269   :  { %v1023_v3 = vpop.f32.mrb[14].mxu1  ;;  %v1519_v4 = vpop.f32.mrb[29].mxu0 }
 0x26a   :  { %v1136_v5 = vadd.f32 %v1129_v1, %v1027_v62  ;;  %v1028_v6 = vadd.f32 %v1023_v3, %v919_v60  ;;  %v1500_v7 = vpop.f32.mrb[15].mxu1  ;;  %v1132_v8 = vpop.f32.mrb[30].mxu0 }
 0x26b   :  { %v1520_v9 = vpop.f32.mrb[31].mxu0 }
 0x26c   :  { %v1145_v10 = vadd.f32 %v1240_v2, %v1136_v5  ;;  %v1137_v11 = vadd.f32 %v1132_v8, %v1028_v6 }
 0x26e   :  { %1147 = vst [vmem:[#allocation8] sm:$0xff] %v1145_v10  ;;  %v1146_v12 = vadd.f32 %v1240_v2, %v1137_v11 }
 0x270   :  { %1148 = vst [vmem:[#allocation8 + $0x8] sm:$0xff] %v1146_v12 }
 0x271   :  { %1680 = shalt.err (!%p1677_p0)
}
 0x272   :  { %s1681_s12 = scalar_lea.hbm %s1924_s5, 256 }
 0x273   :  { %p1682_p1 = scmp.ne.s32.totalorder %s1924_s5, %s1681_s12  ;;  %p1685_p2 = scmp.lt.u32.totalorder %s1681_s12, %s1924_s5 }
 0x275   :  { %p1687_p3 = pnand %p1685_p2, %p1682_p1 }
 0x277   :  { %1690 = shalt.err (!%p1687_p3)
}
 0x278   :  { %1160 = dma.vmem_to_hbm [thread:$0]  %s1155_s9, 256, %s1924_s5, [#allocation4], %s1701_s1, %s1701_s1, %s1702_s17  }
 0x279   :  { %1695 = dma.done.wait [#allocation4], 256  }
 0x27a   :  { %1696 = vsyncadd [#allocation4], 4294967040 }
 0x27b   :  { %1164 = vsyncpa [#allocation3], 1 }
 0x27c   :  { %1165 = vsyncpa [#allocation6], 1 }
 0x27d   :  { %1166 = vsyncpa [#allocation4], 1 }

</bundles_post_ra>
